<compile_context>
chip_gen: v5e
topology: v5e:2x2
jax: 0.10.0
libtpu: 0.0.40
codegen_flags: <defaults>
</compile_context>

<pallas_src>
import functools
import math

import jax
import jax.numpy as jnp
from jax import lax
from jax.experimental import pallas as pl
from jax.experimental.pallas import tpu as pltpu


# ----------------------------- small math helpers ---------------------------

def _sigmoid(x):
    return 1.0 / (1.0 + jnp.exp(-x))


def _softplus(x):
    # matches torch.nn.functional.softplus (beta=1, threshold=20)
    return jnp.where(x > 20.0, x, jnp.log(1.0 + jnp.exp(jnp.minimum(x, 20.0))))


def _silu(v):
    # v * sigmoid(v); reciprocal goes to the EUP slot (approx), VPU stays free.
    return v * pl.reciprocal(1.0 + jnp.exp(-v), approx=True)


# ------------------------------- Pallas kernel ------------------------------

def mamba_module_kernel(
    x_ref,        # (1, L, d_model)                f32
    gamma_ref,    # (1, d_model)                   f32  (pre-scaled by sqrt(d_model))
    w_in_ref,     # (d_model, 2*d_inner)           bf16 (fused in_proj: [x | z])
    conv_w_ref,   # (d_conv, d_inner)              f32
    conv_b_ref,   # (1, d_inner)                   f32
    w_x_ref,      # (d_inner, d_inner + 2*d_state) bf16 ([W_dt_comb | W_B | W_C])
    b_dt_ref,     # (1, d_inner)                   f32
    neg_a_T_ref,  # (d_state, d_inner)             f32  (= (-exp(A_log)).T)
    d_ref,        # (1, d_inner)                   f32
    w_out_ref,    # (d_inner, d_model)             bf16
    out_ref,      # (1, L, d_model)                f32
    delta_s,      # (L, d_inner) f32 scratch
    u_s,          # (L, d_inner) f32 scratch  (= delta * conv_act)
    y_s,          # (L, d_inner) f32 scratch  (scan output)
    b_s,          # (L, d_state) f32 scratch
    c_s,          # (L, d_state) f32 scratch
    *,
    d_inner, d_state, d_conv, seq_len, chunk,
):
    f32 = jnp.float32
    bf16 = jnp.bfloat16
    L = seq_len

    x = x_ref[0]                                              # (L, d_model)

    # ---- RMSNorm (rsqrt; sqrt(d_model) folded into gamma host-side) ----
    ssq = jnp.sum(x * x, axis=-1, keepdims=True)              # (L, 1)
    xn = x * lax.rsqrt(jnp.maximum(ssq, 1e-24)) * gamma_ref[...]

    # ---- fused in_proj: one bf16 MXU pass, split into SSM / gate branches ----
    xz = jnp.dot(xn.astype(bf16), w_in_ref[...], preferred_element_type=f32)
    xin = xz[:, :d_inner]                                     # (L, d_inner)
    z = xz[:, d_inner:]                                       # (L, d_inner)

    # ---- causal depthwise conv1d + SiLU (no padded (L+d_conv-1) buffer) ----
    xc = conv_b_ref[...] + conv_w_ref[d_conv - 1:d_conv, :] * xin   # shift-0 tap
    for k in range(d_conv - 1):                               # taps looking back s steps
        s = d_conv - 1 - k
        shifted = jnp.concatenate(
            [jnp.zeros((s, d_inner), f32), xin[:L - s, :]], axis=0)
        xc = xc + conv_w_ref[k:k + 1, :] * shifted
    xc = _silu(xc)                                            # (L, d_inner)

    # ---- fused x_proj: [dt (folded dt_proj) | B | C] in one bf16 MXU pass ----
    xdbc = jnp.dot(xc.astype(bf16), w_x_ref[...], preferred_element_type=f32)
    delta = _softplus(xdbc[:, :d_inner] + b_dt_ref[...])      # (L, d_inner)
    b_s[...] = xdbc[:, d_inner:d_inner + d_state]             # (L, d_state)
    c_s[...] = xdbc[:, d_inner + d_state:]                    # (L, d_state)
    delta_s[...] = delta
    u_s[...] = delta * xc

    neg_a_T = neg_a_T_ref[...]                                # (d_state, d_inner)

    # ---- selective scan: fori_loop over chunks; inner loop is a pure fma
    #      chain.  dA / dBu are precomputed per chunk (off the h dependency
    #      chain), y is reduced in bulk after each chunk (one XLU pass). ----
    num_chunks = L // chunk

    def chunk_body(cidx, h):
        t0 = pl.multiple_of(cidx * chunk, chunk)
        delta_c = delta_s[pl.ds(t0, chunk), :]                # (chunk, d_inner)
        u_c = u_s[pl.ds(t0, chunk), :]                        # (chunk, d_inner)
        b_c = b_s[pl.ds(t0, chunk), :]                        # (chunk, d_state)
        c_c = c_s[pl.ds(t0, chunk), :]                        # (chunk, d_state)

        # bulk, vectorized, not on the serial chain:
        dA_c = jnp.exp(delta_c[:, None, :] * neg_a_T[None, :, :])   # (chunk, d_state, d_inner)
        dBu_c = b_c[:, :, None] * u_c[:, None, :]                   # (chunk, d_state, d_inner)

        hs = []
        for i in range(chunk):                                # serial recurrence (VPU fma only)
            h = dA_c[i] * h + dBu_c[i]                        # (d_state, d_inner)
            hs.append(h)
        h_stack = jnp.stack(hs, axis=0)                       # (chunk, d_state, d_inner)
        # y[t, :] = sum_s C[t, s] * h_t[s, :]  — one bulk sublane reduction.
        y_s[pl.ds(t0, chunk), :] = jnp.sum(c_c[:, :, None] * h_stack, axis=1)
        return h

    h0 = jnp.zeros((d_state, d_inner), f32)
    lax.fori_loop(0, num_chunks, chunk_body, h0)

    # ---- D skip connection, SiLU gate, out_proj, residual ----
    y = y_s[...] + d_ref[...] * xc
    y = y * _silu(z)
    out = jnp.dot(y.astype(bf16), w_out_ref[...], preferred_element_type=f32)
    out_ref[0] = x + out


# ------------------------------ host-side wrapper ---------------------------

def mamba_module_forward(x, params, *, d_state, d_conv, expand):
    B, L, d_model = x.shape
    d_inner = expand * d_model
    dt_rank = math.ceil(d_model / 16)
    f32, bf16 = jnp.float32, jnp.bfloat16

    # ---- parameter prep: transpose to row-major `act @ W`, fuse, cast ----
    gamma = (params["gamma"] * (d_model ** 0.5)).reshape(1, d_model).astype(f32)
    w_in = params["in_proj_w"].T.astype(bf16)                 # (d_model, 2*d_inner)
    conv_w = params["conv_w"][:, 0, :].T.astype(f32)          # (d_conv, d_inner)
    conv_b = params["conv_b"].reshape(1, d_inner).astype(f32)

    w_xp = params["x_proj_w"]                                 # (dt_rank+2*d_state, d_inner)
    w_xdt_t = w_xp[:dt_rank, :].T                             # (d_inner, dt_rank)
    w_xB_t = w_xp[dt_rank:dt_rank + d_state, :].T             # (d_inner, d_state)
    w_xC_t = w_xp[dt_rank + d_state:, :].T                    # (d_inner, d_state)
    # fold dt_proj into x_proj (no nonlinearity in between): one full-K matmul
    w_dt_comb = (w_xdt_t @ params["dt_proj_w"].T).astype(f32) # (d_inner, d_inner)
    w_x = jnp.concatenate([w_dt_comb, w_xB_t, w_xC_t], axis=1).astype(bf16)

    b_dt = params["dt_proj_b"].reshape(1, d_inner).astype(f32)
    neg_a_T = (-jnp.exp(params["A_log"])).T.astype(f32)       # (d_state, d_inner)
    d_vec = params["D"].reshape(1, d_inner).astype(f32)
    w_out = params["out_proj_w"].T.astype(bf16)               # (d_inner, d_model)

    weights = [gamma, w_in, conv_w, conv_b, w_x, b_dt, neg_a_T, d_vec, w_out]

    # sublane-sized scan chunk
    chunk = next(c for c in (8, 4, 2, 1) if L % c == 0)

    kernel = functools.partial(
        mamba_module_kernel,
        d_inner=d_inner, d_state=d_state, d_conv=d_conv,
        seq_len=L, chunk=chunk,
    )

    def full_spec(a):
        return pl.BlockSpec(a.shape, lambda b: (0,) * a.ndim)

    in_specs = [pl.BlockSpec((1, L, d_model), lambda b: (b, 0, 0))]
    in_specs += [full_spec(w) for w in weights]
    out_specs = pl.BlockSpec((1, L, d_model), lambda b: (b, 0, 0))

    scratch_shapes = [
        pltpu.VMEM((L, d_inner), f32),   # delta
        pltpu.VMEM((L, d_inner), f32),   # u = delta * conv_act
        pltpu.VMEM((L, d_inner), f32),   # y (scan output)
        pltpu.VMEM((L, d_state), f32),   # B
        pltpu.VMEM((L, d_state), f32),   # C
    ]

    return pl.pallas_call(
        kernel,
        out_shape=jax.ShapeDtypeStruct((B, L, d_model), f32),
        grid=(B,),
        in_specs=in_specs,
        out_specs=out_specs,
        scratch_shapes=scratch_shapes,
        compiler_params=pltpu.CompilerParams(
            dimension_semantics=("parallel",),
            vmem_limit_bytes=48 * 1024 * 1024,
        ),
    )(x, *weights)


# ------------------------------ pure-JAX reference --------------------------

def mamba_module_reference(x, params, *, d_state, d_conv, expand):
    B, L, d_model = x.shape
    d_inner = expand * d_model
    dt_rank = math.ceil(d_model / 16)

    nrm = jnp.sqrt(jnp.sum(x * x, axis=-1, keepdims=True))
    xn = x / jnp.maximum(nrm, 1e-12) * (d_model ** 0.5) * params["gamma"]

    xz = jnp.einsum("bld,ed->ble", xn, params["in_proj_w"])
    xin, z = xz[..., :d_inner], xz[..., d_inner:]

    w = params["conv_w"][:, 0, :]                      # (d_inner, d_conv)
    xpad = jnp.pad(xin, ((0, 0), (d_conv - 1, 0), (0, 0)))
    xc = jnp.broadcast_to(params["conv_b"], (B, L, d_inner))
    for k in range(d_conv):
        xc = xc + w[:, k] * xpad[:, k:k + L, :]
    xc = xc * _sigmoid(xc)

    xdb = jnp.einsum("blc,ec->ble", xc, params["x_proj_w"])
    dt_low = xdb[..., :dt_rank]
    Bm = xdb[..., dt_rank:dt_rank + d_state]
    Cm = xdb[..., dt_rank + d_state:]
    delta = _softplus(jnp.einsum("blr,cr->blc", dt_low, params["dt_proj_w"])
                      + params["dt_proj_b"])
    A = -jnp.exp(params["A_log"])                      # (d_inner, d_state)

    def step(h, inp):
        d_t, b_t, c_t, u_t = inp
        dA = jnp.exp(d_t[:, :, None] * A[None, :, :])
        dBu = d_t[:, :, None] * b_t[:, None, :] * u_t[:, :, None]
        h = dA * h + dBu
        y_t = jnp.einsum("bcs,bs->bc", h, c_t)
        return h, y_t

    h0 = jnp.zeros((B, d_inner, d_state), jnp.float32)
    xs = (jnp.moveaxis(delta, 1, 0), jnp.moveaxis(Bm, 1, 0),
          jnp.moveaxis(Cm, 1, 0), jnp.moveaxis(xc, 1, 0))
    _, ys = jax.lax.scan(step, h0, xs)
    y = jnp.moveaxis(ys, 0, 1) + params["D"] * xc
    y = y * (z * _sigmoid(z))
    out = jnp.einsum("blc,dc->bld", y, params["out_proj_w"])
    return x + out


# ----------------------------------- main ------------------------------------

def make_params(key, d_model, d_state, d_conv, expand):
    d_inner = expand * d_model
    dt_rank = math.ceil(d_model / 16)
    ks = jax.random.split(key, 8)
    f = jnp.float32
    params = {
        "gamma": jnp.ones((d_model,), f),
        "in_proj_w": 0.1 * jax.random.normal(ks[0], (2 * d_inner, d_model), f),
        "conv_w": 0.1 * jax.random.normal(ks[1], (d_inner, 1, d_conv), f),
        "conv_b": 0.1 * jax.random.normal(ks[2], (d_inner,), f),
        "x_proj_w": 0.1 * jax.random.normal(ks[3], (dt_rank + 2 * d_state, d_inner), f),
        "dt_proj_w": 0.1 * jax.random.normal(ks[4], (d_inner, dt_rank), f),
        "dt_proj_b": 0.1 * jax.random.normal(ks[5], (d_inner,), f),
        "A_log": jnp.log(jnp.tile(jnp.arange(1, d_state + 1, dtype=f), (d_inner, 1))),
        "D": jnp.ones((d_inner,), f),
        "out_proj_w": 0.1 * jax.random.normal(ks[6], (d_model, d_inner), f),
    }
    return params


if __name__ == "__main__":
    B, L = 2, 16
    d_model, d_state, d_conv, d_expand = 32, 8, 4, 2

    key = jax.random.PRNGKey(0)
    kx, kp = jax.random.split(key)
    x = jax.random.normal(kx, (B, L, d_model), jnp.float32)
    params = make_params(kp, d_model, d_state, d_conv, d_expand)

    out = mamba_module_forward(x, params, d_state=d_state, d_conv=d_conv,
                               expand=d_expand)
    out = jax.block_until_ready(out)

    ref = mamba_module_reference(x, params, d_state=d_state, d_conv=d_conv,
                                 expand=d_expand)
    ref = jax.block_until_ready(ref)

    assert out.shape == (B, L, d_model)
    max_err = float(jnp.max(jnp.abs(out - ref)))
    assert jnp.allclose(out, ref, rtol=2e-2, atol=2e-2), max_err

    print("KERNEL_OK")
</pallas_src>

<mosaic_0001>
module attributes {stable_mosaic.version = 11 : i64} {
  func.func @mamba_module_kernel(%arg0: i32, %arg1: memref<1x16x32xf32, #tpu.memory_space<vmem>>, %arg2: memref<1x32xf32, #tpu.memory_space<vmem>>, %arg3: memref<32x128xbf16, #tpu.memory_space<vmem>>, %arg4: memref<4x64xf32, #tpu.memory_space<vmem>>, %arg5: memref<1x64xf32, #tpu.memory_space<vmem>>, %arg6: memref<64x80xbf16, #tpu.memory_space<vmem>>, %arg7: memref<1x64xf32, #tpu.memory_space<vmem>>, %arg8: memref<8x64xf32, #tpu.memory_space<vmem>>, %arg9: memref<1x64xf32, #tpu.memory_space<vmem>>, %arg10: memref<64x32xbf16, #tpu.memory_space<vmem>>, %arg11: memref<1x16x32xf32, #tpu.memory_space<vmem>>, %arg12: memref<16x64xf32, #tpu.memory_space<vmem>>, %arg13: memref<16x64xf32, #tpu.memory_space<vmem>>, %arg14: memref<16x64xf32, #tpu.memory_space<vmem>>, %arg15: memref<16x8xf32, #tpu.memory_space<vmem>>, %arg16: memref<16x8xf32, #tpu.memory_space<vmem>>) attributes {dimension_semantics = [#tpu.dimension_semantics<parallel>], iteration_bounds = array<i64: 2>, scalar_prefetch = 0 : i64, scratch_operands = 5 : i64, tpu.core_type = #tpu.core_type<tc>, window_params = [{transform_indices = @transform_0, window_bounds = array<i64: 1, 16, 32>}, {pipeline_mode = #tpu.pipeline_mode<synchronous>, transform_indices = @transform_1, window_bounds = array<i64: 1, 32>}, {pipeline_mode = #tpu.pipeline_mode<synchronous>, transform_indices = @transform_2, window_bounds = array<i64: 32, 128>}, {pipeline_mode = #tpu.pipeline_mode<synchronous>, transform_indices = @transform_3, window_bounds = array<i64: 4, 64>}, {pipeline_mode = #tpu.pipeline_mode<synchronous>, transform_indices = @transform_4, window_bounds = array<i64: 1, 64>}, {pipeline_mode = #tpu.pipeline_mode<synchronous>, transform_indices = @transform_5, window_bounds = array<i64: 64, 80>}, {pipeline_mode = #tpu.pipeline_mode<synchronous>, transform_indices = @transform_6, window_bounds = array<i64: 1, 64>}, {pipeline_mode = #tpu.pipeline_mode<synchronous>, transform_indices = @transform_7, window_bounds = array<i64: 8, 64>}, {pipeline_mode = #tpu.pipeline_mode<synchronous>, transform_indices = @transform_8, window_bounds = array<i64: 1, 64>}, {pipeline_mode = #tpu.pipeline_mode<synchronous>, transform_indices = @transform_9, window_bounds = array<i64: 64, 32>}, {transform_indices = @transform_10, window_bounds = array<i64: 1, 16, 32>}]} {
    %c0 = arith.constant 0 : index
    %c0_0 = arith.constant 0 : index
    %c0_1 = arith.constant 0 : index
    %0 = vector.load %arg1[%c0, %c0_0, %c0_1] : memref<1x16x32xf32, #tpu.memory_space<vmem>>, vector<1x16x32xf32>
    %1 = vector.shape_cast %0 : vector<1x16x32xf32> to vector<16x32xf32>
    %2 = arith.mulf %1, %1 : vector<16x32xf32>
    %cst = arith.constant dense<0.000000e+00> : vector<16xf32>
    %3 = vector.multi_reduction <add>, %2, %cst [1] : vector<16x32xf32> to vector<16xf32>
    %4 = vector.shape_cast %3 : vector<16xf32> to vector<16x1xf32>
    %cst_2 = arith.constant 1.000000e-24 : f32
    %5 = vector.broadcast %cst_2 : f32 to vector<16x1xf32>
    %6 = arith.maximumf %4, %5 : vector<16x1xf32>
    %7 = math.rsqrt %6 : vector<16x1xf32>
    %8 = vector.broadcast %7 : vector<16x1xf32> to vector<16x32xf32>
    %9 = arith.mulf %1, %8 : vector<16x32xf32>
    %c0_3 = arith.constant 0 : index
    %c0_4 = arith.constant 0 : index
    %10 = vector.load %arg2[%c0_3, %c0_4] : memref<1x32xf32, #tpu.memory_space<vmem>>, vector<1x32xf32>
    %11 = vector.broadcast %10 : vector<1x32xf32> to vector<16x32xf32>
    %12 = arith.mulf %9, %11 : vector<16x32xf32>
    %13 = arith.truncf %12 : vector<16x32xf32> to vector<16x32xbf16>
    %c0_5 = arith.constant 0 : index
    %c0_6 = arith.constant 0 : index
    %14 = vector.load %arg3[%c0_5, %c0_6] : memref<32x128xbf16, #tpu.memory_space<vmem>>, vector<32x128xbf16>
    %cst_7 = arith.constant dense<0.000000e+00> : vector<16x128xf32>
    %15 = tpu.matmul %13, %14, %cst_7 {dimension_numbers = #tpu.dot_dimension_numbers<[1], [0], [0], [1], [0, 0, 1, 1], [], []>} : vector<16x32xbf16>, vector<32x128xbf16>, vector<16x128xf32> -> vector<16x128xf32>
    %16 = vector.extract_strided_slice %15 {offsets = [0, 0], sizes = [16, 64], strides = [1, 1]} : vector<16x128xf32> to vector<16x64xf32>
    %17 = vector.extract_strided_slice %15 {offsets = [0, 64], sizes = [16, 64], strides = [1, 1]} : vector<16x128xf32> to vector<16x64xf32>
    %c0_8 = arith.constant 0 : index
    %c0_9 = arith.constant 0 : index
    %18 = vector.load %arg5[%c0_8, %c0_9] : memref<1x64xf32, #tpu.memory_space<vmem>>, vector<1x64xf32>
    %c3 = arith.constant 3 : index
    %c0_10 = arith.constant 0 : index
    %19 = vector.load %arg4[%c3, %c0_10] : memref<4x64xf32, #tpu.memory_space<vmem>>, vector<1x64xf32>
    %20 = vector.broadcast %19 : vector<1x64xf32> to vector<16x64xf32>
    %21 = arith.mulf %20, %16 : vector<16x64xf32>
    %22 = vector.broadcast %18 : vector<1x64xf32> to vector<16x64xf32>
    %23 = arith.addf %22, %21 : vector<16x64xf32>
    %cst_11 = arith.constant 0.000000e+00 : f32
    %24 = vector.broadcast %cst_11 : f32 to vector<3x64xf32>
    %25 = vector.extract_strided_slice %16 {offsets = [0, 0], sizes = [13, 64], strides = [1, 1]} : vector<16x64xf32> to vector<13x64xf32>
    %26 = tpu.concatenate %24, %25 in 0 : vector<3x64xf32>, vector<13x64xf32> -> vector<16x64xf32>
    %c0_12 = arith.constant 0 : index
    %c0_13 = arith.constant 0 : index
    %27 = vector.load %arg4[%c0_12, %c0_13] : memref<4x64xf32, #tpu.memory_space<vmem>>, vector<1x64xf32>
    %28 = vector.broadcast %27 : vector<1x64xf32> to vector<16x64xf32>
    %29 = arith.mulf %28, %26 : vector<16x64xf32>
    %30 = arith.addf %23, %29 : vector<16x64xf32>
    %cst_14 = arith.constant 0.000000e+00 : f32
    %31 = vector.broadcast %cst_14 : f32 to vector<2x64xf32>
    %32 = vector.extract_strided_slice %16 {offsets = [0, 0], sizes = [14, 64], strides = [1, 1]} : vector<16x64xf32> to vector<14x64xf32>
    %33 = tpu.concatenate %31, %32 in 0 : vector<2x64xf32>, vector<14x64xf32> -> vector<16x64xf32>
    %c1 = arith.constant 1 : index
    %c0_15 = arith.constant 0 : index
    %34 = vector.load %arg4[%c1, %c0_15] : memref<4x64xf32, #tpu.memory_space<vmem>>, vector<1x64xf32>
    %35 = vector.broadcast %34 : vector<1x64xf32> to vector<16x64xf32>
    %36 = arith.mulf %35, %33 : vector<16x64xf32>
    %37 = arith.addf %30, %36 : vector<16x64xf32>
    %cst_16 = arith.constant 0.000000e+00 : f32
    %38 = vector.broadcast %cst_16 : f32 to vector<1x64xf32>
    %39 = vector.extract_strided_slice %16 {offsets = [0, 0], sizes = [15, 64], strides = [1, 1]} : vector<16x64xf32> to vector<15x64xf32>
    %40 = tpu.concatenate %38, %39 in 0 : vector<1x64xf32>, vector<15x64xf32> -> vector<16x64xf32>
    %c2 = arith.constant 2 : index
    %c0_17 = arith.constant 0 : index
    %41 = vector.load %arg4[%c2, %c0_17] : memref<4x64xf32, #tpu.memory_space<vmem>>, vector<1x64xf32>
    %42 = vector.broadcast %41 : vector<1x64xf32> to vector<16x64xf32>
    %43 = arith.mulf %42, %40 : vector<16x64xf32>
    %44 = arith.addf %37, %43 : vector<16x64xf32>
    %cst_18 = arith.constant 0.000000e+00 : f32
    %45 = vector.broadcast %cst_18 : f32 to vector<16x64xf32>
    %46 = arith.subf %45, %44 : vector<16x64xf32>
    %47 = math.exp %46 : vector<16x64xf32>
    %cst_19 = arith.constant 1.000000e+00 : f32
    %48 = vector.broadcast %cst_19 : f32 to vector<16x64xf32>
    %49 = arith.addf %48, %47 : vector<16x64xf32>
    %50 = tpu.reciprocal %49 {approx = true} : vector<16x64xf32> -> vector<16x64xf32>
    %51 = arith.mulf %44, %50 : vector<16x64xf32>
    %52 = arith.truncf %51 : vector<16x64xf32> to vector<16x64xbf16>
    %c0_20 = arith.constant 0 : index
    %c0_21 = arith.constant 0 : index
    %53 = vector.load %arg6[%c0_20, %c0_21] : memref<64x80xbf16, #tpu.memory_space<vmem>>, vector<64x80xbf16>
    %cst_22 = arith.constant dense<0.000000e+00> : vector<16x80xf32>
    %54 = tpu.matmul %52, %53, %cst_22 {dimension_numbers = #tpu.dot_dimension_numbers<[1], [0], [0], [1], [0, 0, 1, 1], [], []>} : vector<16x64xbf16>, vector<64x80xbf16>, vector<16x80xf32> -> vector<16x80xf32>
    %55 = vector.extract_strided_slice %54 {offsets = [0, 0], sizes = [16, 64], strides = [1, 1]} : vector<16x80xf32> to vector<16x64xf32>
    %c0_23 = arith.constant 0 : index
    %c0_24 = arith.constant 0 : index
    %56 = vector.load %arg7[%c0_23, %c0_24] : memref<1x64xf32, #tpu.memory_space<vmem>>, vector<1x64xf32>
    %57 = vector.broadcast %56 : vector<1x64xf32> to vector<16x64xf32>
    %58 = arith.addf %55, %57 : vector<16x64xf32>
    %cst_25 = arith.constant 2.000000e+01 : f32
    %59 = vector.broadcast %cst_25 : f32 to vector<16x64xf32>
    %60 = arith.cmpf ogt, %58, %59 : vector<16x64xf32>
    %cst_26 = arith.constant 2.000000e+01 : f32
    %61 = vector.broadcast %cst_26 : f32 to vector<16x64xf32>
    %62 = arith.minimumf %58, %61 : vector<16x64xf32>
    %63 = math.exp %62 : vector<16x64xf32>
    %cst_27 = arith.constant 1.000000e+00 : f32
    %64 = vector.broadcast %cst_27 : f32 to vector<16x64xf32>
    %65 = arith.addf %64, %63 : vector<16x64xf32>
    %66 = math.log %65 : vector<16x64xf32>
    %67 = arith.select %60, %58, %66 : vector<16x64xi1>, vector<16x64xf32>
    %68 = vector.extract_strided_slice %54 {offsets = [0, 64], sizes = [16, 8], strides = [1, 1]} : vector<16x80xf32> to vector<16x8xf32>
    %c0_28 = arith.constant 0 : index
    %c0_29 = arith.constant 0 : index
    %69 = vector.load %arg15[%c0_28, %c0_29] : memref<16x8xf32, #tpu.memory_space<vmem>>, vector<16x8xf32>
    tpu.vector_store %arg15[%c0_28, %c0_29], %68 {strides = array<i32>} : memref<16x8xf32, #tpu.memory_space<vmem>>, vector<16x8xf32>,
    %70 = vector.extract_strided_slice %54 {offsets = [0, 72], sizes = [16, 8], strides = [1, 1]} : vector<16x80xf32> to vector<16x8xf32>
    %c0_30 = arith.constant 0 : index
    %c0_31 = arith.constant 0 : index
    %71 = vector.load %arg16[%c0_30, %c0_31] : memref<16x8xf32, #tpu.memory_space<vmem>>, vector<16x8xf32>
    tpu.vector_store %arg16[%c0_30, %c0_31], %70 {strides = array<i32>} : memref<16x8xf32, #tpu.memory_space<vmem>>, vector<16x8xf32>,
    %c0_32 = arith.constant 0 : index
    %c0_33 = arith.constant 0 : index
    %72 = vector.load %arg12[%c0_32, %c0_33] : memref<16x64xf32, #tpu.memory_space<vmem>>, vector<16x64xf32>
    tpu.vector_store %arg12[%c0_32, %c0_33], %67 {strides = array<i32>} : memref<16x64xf32, #tpu.memory_space<vmem>>, vector<16x64xf32>,
    %73 = arith.mulf %67, %51 : vector<16x64xf32>
    %c0_34 = arith.constant 0 : index
    %c0_35 = arith.constant 0 : index
    %74 = vector.load %arg13[%c0_34, %c0_35] : memref<16x64xf32, #tpu.memory_space<vmem>>, vector<16x64xf32>
    tpu.vector_store %arg13[%c0_34, %c0_35], %73 {strides = array<i32>} : memref<16x64xf32, #tpu.memory_space<vmem>>, vector<16x64xf32>,
    %c0_36 = arith.constant 0 : index
    %c0_37 = arith.constant 0 : index
    %75 = vector.load %arg8[%c0_36, %c0_37] : memref<8x64xf32, #tpu.memory_space<vmem>>, vector<8x64xf32>
    %cst_38 = arith.constant 0.000000e+00 : f32
    %76 = vector.broadcast %cst_38 : f32 to vector<8x64xf32>
    %c0_i32 = arith.constant 0 : i32
    %c2_i32 = arith.constant 2 : i32
    %77 = arith.addi %c0_i32, %c2_i32 : i32
    %c1_i32 = arith.constant 1 : i32
    %78 = scf.for %arg17 = %c0_i32 to %77 step %c1_i32 iter_args(%arg18 = %76) -> (vector<8x64xf32>)  : i32 {
      %c8_i32 = arith.constant 8 : i32
      %99 = arith.muli %arg17, %c8_i32 : i32
      %100 = tpu.assume_multiple %99, 8 : i32
      %101 = arith.index_cast %100 : i32 to index
      %c0_52 = arith.constant 0 : index
      %102 = vector.load %arg12[%101, %c0_52] : memref<16x64xf32, #tpu.memory_space<vmem>>, vector<8x64xf32>
      %103 = arith.index_cast %100 : i32 to index
      %c0_53 = arith.constant 0 : index
      %104 = vector.load %arg13[%103, %c0_53] : memref<16x64xf32, #tpu.memory_space<vmem>>, vector<8x64xf32>
      %105 = arith.index_cast %100 : i32 to index
      %c0_54 = arith.constant 0 : index
      %106 = vector.load %arg15[%105, %c0_54] : memref<16x8xf32, #tpu.memory_space<vmem>>, vector<8x8xf32>
      %107 = arith.index_cast %100 : i32 to index
      %c0_55 = arith.constant 0 : index
      %108 = vector.load %arg16[%107, %c0_55] : memref<16x8xf32, #tpu.memory_space<vmem>>, vector<8x8xf32>
      %109 = vector.shape_cast %102 : vector<8x64xf32> to vector<8x1x64xf32>
      %110 = vector.shape_cast %75 : vector<8x64xf32> to vector<1x8x64xf32>
      %111 = vector.broadcast %109 : vector<8x1x64xf32> to vector<8x8x64xf32>
      %112 = vector.broadcast %110 : vector<1x8x64xf32> to vector<8x8x64xf32>
      %113 = arith.mulf %111, %112 : vector<8x8x64xf32>
      %114 = math.exp %113 : vector<8x8x64xf32>
      %115 = vector.shape_cast %106 : vector<8x8xf32> to vector<8x8x1xf32>
      %116 = vector.shape_cast %104 : vector<8x64xf32> to vector<8x1x64xf32>
      %117 = vector.broadcast %115 : vector<8x8x1xf32> to vector<8x8x64xf32>
      %118 = vector.broadcast %116 : vector<8x1x64xf32> to vector<8x8x64xf32>
      %119 = arith.mulf %117, %118 : vector<8x8x64xf32>
      %120 = vector.extract_strided_slice %114 {offsets = [0, 0, 0], sizes = [1, 8, 64], strides = [1, 1, 1]} : vector<8x8x64xf32> to vector<1x8x64xf32>
      %121 = vector.shape_cast %120 : vector<1x8x64xf32> to vector<8x64xf32>
      %122 = arith.mulf %121, %arg18 : vector<8x64xf32>
      %123 = vector.extract_strided_slice %119 {offsets = [0, 0, 0], sizes = [1, 8, 64], strides = [1, 1, 1]} : vector<8x8x64xf32> to vector<1x8x64xf32>
      %124 = vector.shape_cast %123 : vector<1x8x64xf32> to vector<8x64xf32>
      %125 = arith.addf %122, %124 : vector<8x64xf32>
      %126 = vector.extract_strided_slice %114 {offsets = [1, 0, 0], sizes = [1, 8, 64], strides = [1, 1, 1]} : vector<8x8x64xf32> to vector<1x8x64xf32>
      %127 = vector.shape_cast %126 : vector<1x8x64xf32> to vector<8x64xf32>
      %128 = arith.mulf %127, %125 : vector<8x64xf32>
      %129 = vector.extract_strided_slice %119 {offsets = [1, 0, 0], sizes = [1, 8, 64], strides = [1, 1, 1]} : vector<8x8x64xf32> to vector<1x8x64xf32>
      %130 = vector.shape_cast %129 : vector<1x8x64xf32> to vector<8x64xf32>
      %131 = arith.addf %128, %130 : vector<8x64xf32>
      %132 = vector.extract_strided_slice %114 {offsets = [2, 0, 0], sizes = [1, 8, 64], strides = [1, 1, 1]} : vector<8x8x64xf32> to vector<1x8x64xf32>
      %133 = vector.shape_cast %132 : vector<1x8x64xf32> to vector<8x64xf32>
      %134 = arith.mulf %133, %131 : vector<8x64xf32>
      %135 = vector.extract_strided_slice %119 {offsets = [2, 0, 0], sizes = [1, 8, 64], strides = [1, 1, 1]} : vector<8x8x64xf32> to vector<1x8x64xf32>
      %136 = vector.shape_cast %135 : vector<1x8x64xf32> to vector<8x64xf32>
      %137 = arith.addf %134, %136 : vector<8x64xf32>
      %138 = vector.extract_strided_slice %114 {offsets = [3, 0, 0], sizes = [1, 8, 64], strides = [1, 1, 1]} : vector<8x8x64xf32> to vector<1x8x64xf32>
      %139 = vector.shape_cast %138 : vector<1x8x64xf32> to vector<8x64xf32>
      %140 = arith.mulf %139, %137 : vector<8x64xf32>
      %141 = vector.extract_strided_slice %119 {offsets = [3, 0, 0], sizes = [1, 8, 64], strides = [1, 1, 1]} : vector<8x8x64xf32> to vector<1x8x64xf32>
      %142 = vector.shape_cast %141 : vector<1x8x64xf32> to vector<8x64xf32>
      %143 = arith.addf %140, %142 : vector<8x64xf32>
      %144 = vector.extract_strided_slice %114 {offsets = [4, 0, 0], sizes = [1, 8, 64], strides = [1, 1, 1]} : vector<8x8x64xf32> to vector<1x8x64xf32>
      %145 = vector.shape_cast %144 : vector<1x8x64xf32> to vector<8x64xf32>
      %146 = arith.mulf %145, %143 : vector<8x64xf32>
      %147 = vector.extract_strided_slice %119 {offsets = [4, 0, 0], sizes = [1, 8, 64], strides = [1, 1, 1]} : vector<8x8x64xf32> to vector<1x8x64xf32>
      %148 = vector.shape_cast %147 : vector<1x8x64xf32> to vector<8x64xf32>
      %149 = arith.addf %146, %148 : vector<8x64xf32>
      %150 = vector.extract_strided_slice %114 {offsets = [5, 0, 0], sizes = [1, 8, 64], strides = [1, 1, 1]} : vector<8x8x64xf32> to vector<1x8x64xf32>
      %151 = vector.shape_cast %150 : vector<1x8x64xf32> to vector<8x64xf32>
      %152 = arith.mulf %151, %149 : vector<8x64xf32>
      %153 = vector.extract_strided_slice %119 {offsets = [5, 0, 0], sizes = [1, 8, 64], strides = [1, 1, 1]} : vector<8x8x64xf32> to vector<1x8x64xf32>
      %154 = vector.shape_cast %153 : vector<1x8x64xf32> to vector<8x64xf32>
      %155 = arith.addf %152, %154 : vector<8x64xf32>
      %156 = vector.extract_strided_slice %114 {offsets = [6, 0, 0], sizes = [1, 8, 64], strides = [1, 1, 1]} : vector<8x8x64xf32> to vector<1x8x64xf32>
      %157 = vector.shape_cast %156 : vector<1x8x64xf32> to vector<8x64xf32>
      %158 = arith.mulf %157, %155 : vector<8x64xf32>
      %159 = vector.extract_strided_slice %119 {offsets = [6, 0, 0], sizes = [1, 8, 64], strides = [1, 1, 1]} : vector<8x8x64xf32> to vector<1x8x64xf32>
      %160 = vector.shape_cast %159 : vector<1x8x64xf32> to vector<8x64xf32>
      %161 = arith.addf %158, %160 : vector<8x64xf32>
      %162 = vector.extract_strided_slice %114 {offsets = [7, 0, 0], sizes = [1, 8, 64], strides = [1, 1, 1]} : vector<8x8x64xf32> to vector<1x8x64xf32>
      %163 = vector.shape_cast %162 : vector<1x8x64xf32> to vector<8x64xf32>
      %164 = arith.mulf %163, %161 : vector<8x64xf32>
      %165 = vector.extract_strided_slice %119 {offsets = [7, 0, 0], sizes = [1, 8, 64], strides = [1, 1, 1]} : vector<8x8x64xf32> to vector<1x8x64xf32>
      %166 = vector.shape_cast %165 : vector<1x8x64xf32> to vector<8x64xf32>
      %167 = arith.addf %164, %166 : vector<8x64xf32>
      %168 = vector.shape_cast %125 : vector<8x64xf32> to vector<1x8x64xf32>
      %169 = vector.shape_cast %131 : vector<8x64xf32> to vector<1x8x64xf32>
      %170 = vector.shape_cast %137 : vector<8x64xf32> to vector<1x8x64xf32>
      %171 = vector.shape_cast %143 : vector<8x64xf32> to vector<1x8x64xf32>
      %172 = vector.shape_cast %149 : vector<8x64xf32> to vector<1x8x64xf32>
      %173 = vector.shape_cast %155 : vector<8x64xf32> to vector<1x8x64xf32>
      %174 = vector.shape_cast %161 : vector<8x64xf32> to vector<1x8x64xf32>
      %175 = vector.shape_cast %167 : vector<8x64xf32> to vector<1x8x64xf32>
      %176 = tpu.concatenate %168, %169, %170, %171, %172, %173, %174, %175 in 0 : vector<1x8x64xf32>, vector<1x8x64xf32>, vector<1x8x64xf32>, vector<1x8x64xf32>, vector<1x8x64xf32>, vector<1x8x64xf32>, vector<1x8x64xf32>, vector<1x8x64xf32> -> vector<8x8x64xf32>
      %177 = vector.shape_cast %108 : vector<8x8xf32> to vector<8x8x1xf32>
      %178 = vector.broadcast %177 : vector<8x8x1xf32> to vector<8x8x64xf32>
      %179 = arith.mulf %178, %176 : vector<8x8x64xf32>
      %cst_56 = arith.constant dense<0.000000e+00> : vector<8x64xf32>
      %180 = vector.multi_reduction <add>, %179, %cst_56 [1] : vector<8x8x64xf32> to vector<8x64xf32>
      %181 = arith.index_cast %100 : i32 to index
      %c0_57 = arith.constant 0 : index
      %182 = vector.load %arg14[%181, %c0_57] : memref<16x64xf32, #tpu.memory_space<vmem>>, vector<8x64xf32>
      tpu.vector_store %arg14[%181, %c0_57], %180 {strides = array<i32>} : memref<16x64xf32, #tpu.memory_space<vmem>>, vector<8x64xf32>,
      scf.yield %167 : vector<8x64xf32>
    }
    %c2_i32_39 = arith.constant 2 : i32
    %c0_40 = arith.constant 0 : index
    %c0_41 = arith.constant 0 : index
    %79 = vector.load %arg14[%c0_40, %c0_41] : memref<16x64xf32, #tpu.memory_space<vmem>>, vector<16x64xf32>
    %c0_42 = arith.constant 0 : index
    %c0_43 = arith.constant 0 : index
    %80 = vector.load %arg9[%c0_42, %c0_43] : memref<1x64xf32, #tpu.memory_space<vmem>>, vector<1x64xf32>
    %81 = vector.broadcast %80 : vector<1x64xf32> to vector<16x64xf32>
    %82 = arith.mulf %81, %51 : vector<16x64xf32>
    %83 = arith.addf %79, %82 : vector<16x64xf32>
    %cst_44 = arith.constant 0.000000e+00 : f32
    %84 = vector.broadcast %cst_44 : f32 to vector<16x64xf32>
    %85 = arith.subf %84, %17 : vector<16x64xf32>
    %86 = math.exp %85 : vector<16x64xf32>
    %cst_45 = arith.constant 1.000000e+00 : f32
    %87 = vector.broadcast %cst_45 : f32 to vector<16x64xf32>
    %88 = arith.addf %87, %86 : vector<16x64xf32>
    %89 = tpu.reciprocal %88 {approx = true} : vector<16x64xf32> -> vector<16x64xf32>
    %90 = arith.mulf %17, %89 : vector<16x64xf32>
    %91 = arith.mulf %83, %90 : vector<16x64xf32>
    %92 = arith.truncf %91 : vector<16x64xf32> to vector<16x64xbf16>
    %c0_46 = arith.constant 0 : index
    %c0_47 = arith.constant 0 : index
    %93 = vector.load %arg10[%c0_46, %c0_47] : memref<64x32xbf16, #tpu.memory_space<vmem>>, vector<64x32xbf16>
    %cst_48 = arith.constant dense<0.000000e+00> : vector<16x32xf32>
    %94 = tpu.matmul %92, %93, %cst_48 {dimension_numbers = #tpu.dot_dimension_numbers<[1], [0], [0], [1], [0, 0, 1, 1], [], []>} : vector<16x64xbf16>, vector<64x32xbf16>, vector<16x32xf32> -> vector<16x32xf32>
    %95 = arith.addf %1, %94 : vector<16x32xf32>
    %c0_49 = arith.constant 0 : index
    %c0_50 = arith.constant 0 : index
    %c0_51 = arith.constant 0 : index
    %96 = vector.load %arg11[%c0_49, %c0_50, %c0_51] : memref<1x16x32xf32, #tpu.memory_space<vmem>>, vector<1x16x32xf32>
    %97 = vector.shape_cast %96 : vector<1x16x32xf32> to vector<16x32xf32>
    %98 = vector.shape_cast %95 : vector<16x32xf32> to vector<1x16x32xf32>
    tpu.vector_store %arg11[%c0_49, %c0_50, %c0_51], %98 {strides = array<i32>} : memref<1x16x32xf32, #tpu.memory_space<vmem>>, vector<1x16x32xf32>,
    return
  }
  func.func @transform_0(%arg0: i32) -> (i32, i32, i32) {
    %c0_i32 = arith.constant 0 : i32
    %c0_i32_0 = arith.constant 0 : i32
    %c0_i32_1 = arith.constant 0 : i32
    return %arg0, %c0_i32, %c0_i32_0 : i32, i32, i32
  }
  func.func @transform_1(%arg0: i32) -> (i32, i32) {
    %c0_i32 = arith.constant 0 : i32
    %c0_i32_0 = arith.constant 0 : i32
    %c0_i32_1 = arith.constant 0 : i32
    return %c0_i32, %c0_i32_0 : i32, i32
  }
  func.func @transform_2(%arg0: i32) -> (i32, i32) {
    %c0_i32 = arith.constant 0 : i32
    %c0_i32_0 = arith.constant 0 : i32
    %c0_i32_1 = arith.constant 0 : i32
    return %c0_i32, %c0_i32_0 : i32, i32
  }
  func.func @transform_3(%arg0: i32) -> (i32, i32) {
    %c0_i32 = arith.constant 0 : i32
    %c0_i32_0 = arith.constant 0 : i32
    %c0_i32_1 = arith.constant 0 : i32
    return %c0_i32, %c0_i32_0 : i32, i32
  }
  func.func @transform_4(%arg0: i32) -> (i32, i32) {
    %c0_i32 = arith.constant 0 : i32
    %c0_i32_0 = arith.constant 0 : i32
    %c0_i32_1 = arith.constant 0 : i32
    return %c0_i32, %c0_i32_0 : i32, i32
  }
  func.func @transform_5(%arg0: i32) -> (i32, i32) {
    %c0_i32 = arith.constant 0 : i32
    %c0_i32_0 = arith.constant 0 : i32
    %c0_i32_1 = arith.constant 0 : i32
    return %c0_i32, %c0_i32_0 : i32, i32
  }
  func.func @transform_6(%arg0: i32) -> (i32, i32) {
    %c0_i32 = arith.constant 0 : i32
    %c0_i32_0 = arith.constant 0 : i32
    %c0_i32_1 = arith.constant 0 : i32
    return %c0_i32, %c0_i32_0 : i32, i32
  }
  func.func @transform_7(%arg0: i32) -> (i32, i32) {
    %c0_i32 = arith.constant 0 : i32
    %c0_i32_0 = arith.constant 0 : i32
    %c0_i32_1 = arith.constant 0 : i32
    return %c0_i32, %c0_i32_0 : i32, i32
  }
  func.func @transform_8(%arg0: i32) -> (i32, i32) {
    %c0_i32 = arith.constant 0 : i32
    %c0_i32_0 = arith.constant 0 : i32
    %c0_i32_1 = arith.constant 0 : i32
    return %c0_i32, %c0_i32_0 : i32, i32
  }
  func.func @transform_9(%arg0: i32) -> (i32, i32) {
    %c0_i32 = arith.constant 0 : i32
    %c0_i32_0 = arith.constant 0 : i32
    %c0_i32_1 = arith.constant 0 : i32
    return %c0_i32, %c0_i32_0 : i32, i32
  }
  func.func @transform_10(%arg0: i32) -> (i32, i32, i32) {
    %c0_i32 = arith.constant 0 : i32
    %c0_i32_0 = arith.constant 0 : i32
    %c0_i32_1 = arith.constant 0 : i32
    return %arg0, %c0_i32, %c0_i32_0 : i32, i32, i32
  }
}

</mosaic_0001>

<bundles_post_ra>
// kernel: tpu_custom_call.1
= control target key start
LH: loop header
LB: loop body
LE: loop exit
PB: predicated region body
PF: predicated region fallthrough
CT: control target
= control target key end

     0   :  { %s1992_s0 = inlined_call_operand.vmem [shape: f32[2,16,32], index: 0, kind: input, shape index: {}]   ;;  %s1993_s1 = inlined_call_operand.hbm [shape: f32[1,32], index: 1, kind: input, shape index: {}]   ;;  %s1994_s2 = inlined_call_operand.vmem [shape: bf16[32,128], index: 2, kind: input, shape index: {}]   ;;  %s1995_s3 = inlined_call_operand.hbm [shape: f32[4,64], index: 3, kind: input, shape index: {}]   ;;  %s1996_s4 = inlined_call_operand.vmem [shape: f32[1,64], index: 4, kind: input, shape index: {}]   ;;  %s1997_s5 = inlined_call_operand.hbm [shape: bf16[64,80], index: 5, kind: input, shape index: {}]   ;;  %s1998_s6 = inlined_call_operand.vmem [shape: f32[1,64], index: 6, kind: input, shape index: {}]   ;;  %s1999_s7 = inlined_call_operand.hbm [shape: f32[8,64], index: 7, kind: input, shape index: {}]   ;;  %s2000_s8 = inlined_call_operand.vmem [shape: f32[1,64], index: 8, kind: input, shape index: {}]   ;;  %s2001_s9 = inlined_call_operand.vmem [shape: bf16[64,32], index: 9, kind: input, shape index: {}]   ;;  %s2002_s10 = inlined_call_operand.hbm [shape: f32[2,16,32], index: 10, kind: output, shape index: {}]  }
   0x1   :  { %2007 = sst [smem:[#allocation24_spill]] %s1993_s1 }
   0x2   :  { %2008 = sst [smem:[#allocation25_spill]] %s1995_s3 }
   0x3   :  { %15 = vsyncpa [#allocation8], 0 }
   0x4   :  { %16 = vsyncpa [#allocation11], 0 }
   0x5   :  { %17 = vsyncpa [#allocation14], 0 }
   0x6   :  { %18 = vsyncpa [#allocation9], 0 }
   0x7   :  { %20 = vsyncpa [#allocation9 + $0x1], 0  ;;  %s1703_s13 = smov 0   ;;  %s1705_s14 = smov 0  }
   0x8   :  { %s1707_s15 = smov 0   ;;  %s1709_s16 = smov 0  }
   0x9 LB: > { %2009 = sst [smem:[#allocation20_spill]] %s1624_s15  ;;  %s1724_s17 = sadd.s32 4294967295, %s1628_s16   ;;  %s1628_s16 = sphi %s1709_s16, %s2020_s16   ;;  %s1624_s15 = sphi %s1707_s15, %s2022_s15   ;;  %s1620_s14 = sphi %s1705_s14, %s2024_s14   ;;  %s1616_s13 = sphi %s1703_s13, %s2023_s13  }
   0xa   : > { %s1193_s18 = sadd.s32 4294967294, %s1628_s16   ;;  %s1728_s19 = sadd.s32 1, %s1628_s16  }
   0xb   : > { %2010 = sst [smem:[#allocation21_spill]] %s1728_s19  ;;  %s248_s20 = sadd.s32 1, %s1624_s15 }
   0xc   : > { %s245_s21 = ssub.s32 %s1628_s16, %s1728_s19  ;;  %p258_p0 = scmp.ne.s32.totalorder %s1624_s15, %s1620_s14 }
   0xd   : > { %p246_p1 = scmp.eq.s32.totalorder %s245_s21, 0  ;;  %p259_p2 = scmp.eq.s32.totalorder %s1724_s17, 1 }
   0xe   : > { %p264_p3 = scmp.ne.s32.totalorder %s1620_s14, %s1616_s13  ;;  %p265_p4 = scmp.eq.s32.totalorder %s1193_s18, 1 }
   0xf   : > { %s1739_s22 = scalar_select %p246_p1, %s1624_s15, %s248_s20  }
  0x10   : > { %p1741_p5 = por %p259_p2, %p258_p0  ;;  %p1745_p6 = por %p265_p4, %p264_p3 }
  0x11   : > { %2011 = sst [smem:[#allocation22_spill]] %s1739_s22  ;;  %p1194_p7 = scmp.ge.s32.totalorder %s1628_s16, 1 }
  0x12   : > { %s2013_s24 = scalar_select %p1745_p6, 1, 0 }
  0x13   : > { %p272_p8 = scmp.lt.s32.totalorder %s1628_s16, 3  ;;  %p1304_p9 = scmp.eq.s32.totalorder %s1724_s17, 0 }
  0x14   : > { %2014 = sst [smem:[#allocation23_spill]] %s2013_s24  ;;  %s1638_s29 = smov [#allocation10]  }
  0x15   : > { %p1752_p10 = pnand %p1194_p7, %p272_p8  ;;  %s2016_s3 = sld [smem:[#allocation25_spill]] }
  0x16   : > { %s301_s30 = sshll.u32 %s1638_s29, 4  ;;  %s2017_s1 = sld [smem:[#allocation24_spill]]  ;;  %s302_s30 = int_to_ptr.vmem [resolvable:$true] %s301_s30 }
  0x17   : > { %p1287_p11 = pneg %p1752_p10  ;;  %s313_s27 = sshll.u32 %s1997_s5, 4  ;;  %s314_s27 = int_to_ptr.hbm [resolvable:$true] %s313_s27 }
  0x18   : > { %s1640_s11 = smov [#allocation12]   ;;  %s331_s15 = sshll.u32 %s1999_s7, 4  ;;  %s332_s15 = int_to_ptr.hbm [resolvable:$true] %s331_s15 }
  0x19   : > { %p1766_p12 = pnand %p1304_p9, %p1287_p11  ;;  %s315_s12 = sshll.u32 %s1640_s11, 4  ;;  %s316_s12 = int_to_ptr.vmem [resolvable:$true] %s315_s12 }
  0x1a   : > { %s1641_s19 = smov 64   ;;  %s1642_s24 = smov 4  }
  0x1b   : > { %s299_s28 = sshll.u32 %s2016_s3, 4  ;;  %s1639_s3 = smov [#allocation7]   ;;  %s300_s28 = int_to_ptr.hbm [resolvable:$true] %s299_s28 }
  0x1c   : > { %s284_s18 = sshll.u32 %s2017_s1, 4  ;;  %s286_s29 = sshll.u32 %s1639_s3, 4  ;;  %s285_s18 = int_to_ptr.hbm [resolvable:$true] %s284_s18  ;;  %s287_s29 = int_to_ptr.vmem [resolvable:$true] %s286_s29 }
  0x1d   : > { %1293 = dma.hbm_to_vmem [thread:$0]  (!%p1766_p12), %s300_s28, 64, %s302_s30, [#allocation11]  }
  0x1e   : > { %1290 = dma.hbm_to_vmem [thread:$0]  (!%p1766_p12), %s285_s18, 16, %s287_s29, [#allocation8]  }
  0x1f   : > { %1296 = dma.hbm_to_vmem [thread:$0]  (!%p1766_p12), %s314_s27, 512, %s316_s12, [#allocation11], %s1641_s19, %s1641_s19, %s1642_s24  }
  0x20   : > { %s1643_s3 = smov [#allocation13]   ;;  %360 = sbr.rel (%p1752_p10) target bundleno = 1077 (0x435), region = 60 }
  0x21   : > { %s333_s21 = sshll.u32 %s1643_s3, 4  ;;  %s334_s21 = int_to_ptr.vmem [resolvable:$true] %s333_s21 }
  0x22   : > { %1299 = dma.hbm_to_vmem [thread:$0]  (!%p1766_p12), %s332_s15, 128, %s334_s21, [#allocation14]  }
  0x25   : > { %1599 = dma.done.wait (%p1304_p9), [#allocation8], 16  }
  0x26   : > { %1601 = vsyncadd (%p1304_p9), [#allocation8], 4294967280 }
  0x27   : > { %1603 = dma.done.wait (%p1304_p9), [#allocation11], 576  }
  0x28   : > { %1605 = vsyncadd (%p1304_p9), [#allocation11], 4294966720 }
  0x29   : > { %1607 = dma.done.wait (%p1304_p9), [#allocation14], 128  }
  0x2a   : > { %1609 = vsyncadd (%p1304_p9), [#allocation14], 4294967168  ;;  %p414_p13 = scmp.lt.s32.totalorder %s1724_s17, 1  ;;  %v1803_v0 = vld [vmem:[#allocation13] sm:$0xff]  ;;  %vm424_vm0 = vcmask 261120   ;;  %s411_s25 = sand.u32 1, %s1620_s14  }
  0x2b   : > { %s1818_s28 = sshll.u32 %s411_s25, 4  ;;  %v1259_v7 = vld [vmem:[%s1994_s2 + $0x8] sm:$0xff]  ;;  %v1258_v8 = vld [vmem:[%s1994_s2] sm:$0xff]  ;;  %v1371_v27 = vld [vmem:[#allocation7] ss:$0 sm:$0xff]  ;;  %vm507_vm7 = vcmask 1042432  }
  0x2c   : > { %s415_s1 = scalar_select %p414_p13, %s1724_s17, 1  ;;  %487 = vmatpush.bf16.msra.mxu0 %v1259_v7  ;;  %v1263_v33 = vld [vmem:[#allocation12 + $0x18] sm:$0xff]  ;;  %v1262_v34 = vld [vmem:[#allocation12 + $0x10] sm:$0xff]  ;;  %v1261_v35 = vld [vmem:[#allocation12 + $0x8] sm:$0xff]  ;;  %vm520_vm8 = vcmask 1041408   ;;  %vm533_vm9 = vcmask 1040384  }
  0x2d   : > { %599 = vmatpush.bf16.msra.mxu1 %v1263_v33  ;;  %v1260_v36 = vld [vmem:[#allocation12] sm:$0xff]  ;;  %v1375_v37 = vld [vmem:[#allocation10 + $0x3] ss:$0 sm:$0xff]  ;;  %v1376_v38 = vld [vmem:[%s1996_s4] ss:$0 sm:$0xff]  ;;  %vm591_vm10 = vcmask 523264  }
  0x2e   : > { %s1257_s15 = sshll.u32 %s415_s1, 4  ;;  %v1372_v40 = vld [vmem:[#allocation10] ss:$0 sm:$0xff]  ;;  %v1373_v45 = vld [vmem:[#allocation10 + $0x1] ss:$0 sm:$0xff]  ;;  %s1644_s3 = smov 56  }
  0x2f   : > { %s418_s24 = scalar_lea.vmem %s1992_s0, %s1257_s15  ;;  %v1374_v50 = vld [vmem:[#allocation10 + $0x2] ss:$0 sm:$0xff]  ;;  %s1645_s21 = smov 64   ;;  %vm639_vm13 = vcmask 64512  }
  0x30   : > { %v1805_v1 = vld [vmem:[%s418_s24] sm:$0xff]  ;;  %v1807_v2 = vld [vmem:[%s418_s24 + $0x8] sm:$0xff]  ;;  %488 = vmatpush.bf16.msra.mxu0 %v1258_v8  ;;  %s1869_s1 = scalar_lea.vmem [#allocation15], %s1818_s28  ;;  %s1873_s15 = smov 0  }
  0x31   : > { %v422_v3 = vmul.f32 %v1805_v1, %v1805_v1  ;;  %v423_v5 = vmul.f32 %v1807_v2, %v1807_v2  ;;  %600 = vmatpush.bf16.msra.mxu1 %v1262_v34 }
  0x33   : > { %v425_v4 = vsel %vm424_vm0, %v422_v3, 0.0  ;;  %v428_v6 = vsel %vm424_vm0, %v423_v5, 0.0 }
  0x34   : > { %426 = vadd.xlane.f32.xlu0 %v425_v4 }
  0x35   : > { %601 = vmatpush.bf16.msra.mxu1 %v1261_v35 }
  0x39   : > { %602 = vmatpush.bf16.msra.mxu1 %v1260_v36 }
  0x3c   : > { %429 = vadd.xlane.f32.xlu0 %v428_v6 }
  0xa7   : > { %v427_v9 = vpop.xlane.xlu0 %426 }
  0xa8   : > { %v431_v10 = vmax.f32 %v427_v9, 1e-24 }
  0xaa   : > { %1378 = vrsqrt.f32 %v431_v10  ;;  %vm439_vm2 = vweird.f32 %v431_v10 }
  0xaf   : > { %v430_v11 = vpop.xlane.xlu0 %429 }
  0xb0   : > { %v1379_v12 = vpop.eup %1378  ;;  %v432_v13 = vmax.f32 %v430_v11, 1e-24 }
  0xb1   : > { %v434_v14 = vmul.f32 %v1379_v12, %v431_v10  ;;  %vm440_vm1 = vweird.f32 %v1379_v12 }
  0xb2   : > { %1380 = vrsqrt.f32 %v432_v13  ;;  %vm441_vm3 = vmor %vm439_vm2, %vm440_vm1  ;;  %vm449_vm5 = vweird.f32 %v432_v13 }
  0xb3   : > { %v435_v15 = vmul.f32 %v1379_v12, %v434_v14 }
  0xb5   : > { %v436_v16 = vmul.f32 0.5, %v435_v15 }
  0xb7   : > { %v437_v17 = vsub.f32 1.5, %v436_v16 }
  0xb8   : > { %v1381_v18 = vpop.eup %1380 }
  0xb9   : > { %v444_v19 = vmul.f32 %v1381_v18, %v432_v13  ;;  %v438_v20 = vmul.f32 %v1379_v12, %v437_v17  ;;  %vm450_vm4 = vweird.f32 %v1381_v18 }
  0xba   : > { %vm451_vm6 = vmor %vm449_vm5, %vm450_vm4 }
  0xbb   : > { %v445_v21 = vmul.f32 %v1381_v18, %v444_v19  ;;  %v442_v23 = vsel %vm441_vm3, %v1379_v12, %v438_v20 }
  0xbc   : > { %v453_v26 = vmul.f32 %v442_v23, %v1805_v1 }
  0xbd   : > { %v446_v22 = vmul.f32 0.5, %v445_v21 }
  0xbe   : > { %v459_v30 = vmul.f32 %v1371_v27, %v453_v26 }
  0xbf   : > { %v447_v24 = vsub.f32 1.5, %v446_v22 }
  0xc1   : > { %v448_v25 = vmul.f32 %v1381_v18, %v447_v24  ;;  %v1377_v24 = vld [vmem:[%s1998_s6] ss:$0 sm:$0xff] }
  0xc3   : > { %v452_v28 = vsel %vm451_vm6, %v1381_v18, %v448_v25 }
  0xc4   : > { %v454_v29 = vmul.f32 %v452_v28, %v1807_v2 }
  0xc6   : > { %v460_v31 = vmul.f32 %v1371_v27, %v454_v29 }
  0xc8   : > { %v461_v32 = vpack.c.bf16 %v460_v31, %v459_v30 }
  0xca   : > { %1216 = vmatmul.msk.bf16.vlgmr.msra.gmra.mxu0 %vm424_vm0, %v461_v32 }
 0x147   : > { %v1832_v39 = vpop.f32.mrf.mxu0 }
 0x148   : > { %v508_v41 = vrot.slane %v1832_v39, 5  ;;  %v521_v42 = vrot.slane %v1832_v39, 6  ;;  %v534_v43 = vrot.slane %v1832_v39, 7  ;;  %v498_v44 = vmul.f32 %v1375_v37, %v1832_v39 }
 0x14a   : > { %v513_v46 = vsel %vm507_vm7, 0.0, %v508_v41  ;;  %v526_v47 = vsel %vm520_vm8, 0.0, %v521_v42  ;;  %v503_v48 = vadd.f32 %v1376_v38, %v498_v44  ;;  %v539_v51 = vsel %vm533_vm9, 0.0, %v534_v43 }
 0x14b   : > { %v516_v49 = vmul.f32 %v1372_v40, %v513_v46  ;;  %v529_v52 = vmul.f32 %v1373_v45, %v526_v47  ;;  %v542_v54 = vmul.f32 %v1374_v50, %v539_v51 }
 0x14d   : > { %v518_v53 = vadd.f32 %v516_v49, %v503_v48 }
 0x14f   : > { %v1841_v55 = vpop.f32.mrf.mxu0  ;;  %v531_v56 = vadd.f32 %v529_v52, %v518_v53 }
 0x150   : > { %v499_v57 = vmul.f32 %v1375_v37, %v1841_v55  ;;  %v509_v58 = vrot.slane %v1841_v55, 5  ;;  %v522_v59 = vrot.slane %v1841_v55, 6  ;;  %v535_v60 = vrot.slane %v1841_v55, 7 }
 0x151   : > { %v544_v61 = vadd.f32 %v542_v54, %v531_v56 }
 0x152   : > { %v504_v62 = vadd.f32 %v1376_v38, %v499_v57  ;;  %v510_v63 = vsel %vm507_vm7, %v508_v41, %v509_v58  ;;  %v523_v3 = vsel %vm520_vm8, %v521_v42, %v522_v59  ;;  %v536_v6 = vsel %vm533_vm9, %v534_v43, %v535_v60 }
 0x153   : > { %v517_v4 = vmul.f32 %v1372_v40, %v510_v63  ;;  %v546_v5 = vsub.f32 0.0, %v544_v61  ;;  %v530_v8 = vmul.f32 %v1373_v45, %v523_v3  ;;  %v543_v11 = vmul.f32 %v1374_v50, %v536_v6 }
 0x154   : > { %v1871_v50 = vmov 0.0  }
 0x155   : > { %v519_v7 = vadd.f32 %v517_v4, %v504_v62  ;;  %v548_v9 = vmul.f32 1.442695, %v546_v5 }
 0x157   : > { %v532_v10 = vadd.f32 %v530_v8, %v519_v7  ;;  %1382 = vpow2.f32 %v548_v9 }
 0x159   : > { %v545_v12 = vadd.f32 %v543_v11, %v532_v10 }
 0x15b   : > { %v547_v13 = vsub.f32 0.0, %v545_v12 }
 0x15d   : > { %v550_v14 = vmul.f32 1.442695, %v547_v13  ;;  %v1383_v15 = vpop.eup %1382 }
 0x15e   : > { %v552_v16 = vadd.f32 1.0, %v1383_v15 }
 0x15f   : > { %1384 = vpow2.f32 %v550_v14 }
 0x160   : > { %1386 = vrcp.f32 %v552_v16 }
 0x165   : > { %v1385_v17 = vpop.eup %1384 }
 0x166   : > { %v553_v18 = vadd.f32 1.0, %v1385_v17  ;;  %v1387_v19 = vpop.eup %1386 }
 0x167   : > { %v1850_v21 = vmul.f32 %v1387_v19, %v544_v61 }
 0x168   : > { %1388 = vrcp.f32 %v553_v18 }
 0x16e   : > { %v1389_v20 = vpop.eup %1388 }
 0x16f   : > { %v1852_v22 = vmul.f32 %v1389_v20, %v545_v12 }
 0x171   : > { %v558_v23 = vpack.c.bf16 %v1852_v22, %v1850_v21 }
 0x173   : > { %1233 = vmatmul.msk.bf16.vlgmr.msra.gmra.mxu1 %vm591_vm10, %v558_v23 }
 0x1f0   : > { %v604_v25 = vpop.f32.mrf.mxu1 }
 0x1f1   : > { %v613_v26 = vadd.f32 %v1377_v24, %v604_v25  ;;  %642 = vrot.lane.b32.xlu2 %v604_v25, %s1644_s3  ;;  %633 = vrot.lane.b32.xlu1 %v604_v25, %s1645_s21 }
 0x1f3   : > { %v617_v27 = vmin.f32 %v613_v26, 20.0  ;;  %vm615_vm11 = vcmp.gt.f32.partialorder %v613_v26, 20.0 }
 0x1f5   : > { %v619_v28 = vmul.f32 1.442695, %v617_v27 }
 0x1f7   : > { %1390 = vpow2.f32 %v619_v28 }
 0x1f8   : > { %v606_v29 = vpop.f32.mrf.mxu1 }
 0x1f9   : > { %v614_v30 = vadd.f32 %v1377_v24, %v606_v29  ;;  %644 = vrot.lane.b32.xlu2 %v606_v29, %s1644_s3  ;;  %635 = vrot.lane.b32.xlu1 %v606_v29, %s1645_s21 }
 0x1fb   : > { %v618_v31 = vmin.f32 %v614_v30, 20.0  ;;  %vm616_vm12 = vcmp.gt.f32.partialorder %v614_v30, 20.0 }
 0x1fd   : > { %v1391_v32 = vpop.eup %1390  ;;  %v621_v33 = vmul.f32 1.442695, %v618_v31 }
 0x1fe   : > { %v623_v34 = vadd.f32 1.0, %v1391_v32 }
 0x1ff   : > { %1392 = vpow2.f32 %v621_v33 }
 0x200   : > { %1394 = vlog2.f32 %v623_v34 }
 0x205   : > { %v1393_v35 = vpop.eup %1392 }
 0x206   : > { %v1395_v36 = vpop.eup %1394  ;;  %v624_v37 = vadd.f32 1.0, %v1393_v35 }
 0x207   : > { %v626_v38 = vmul.f32 0.6931472, %v1395_v36 }
 0x208   : > { %1396 = vlog2.f32 %v624_v37 }
 0x209   : > { %v629_v40 = vsel %vm615_vm11, %v613_v26, %v626_v38 }
 0x20a   : > { %650 = vst.msk [vmem:[#allocation2] sm:$0xff] %vm591_vm10, %v629_v40  ;;  %v652_v41 = vmul.f32 %v629_v40, %v1850_v21 }
 0x20c   : > { %654 = vst.msk [vmem:[#allocation3] sm:$0xff] %vm591_vm10, %v652_v41 }
 0x20e   : > { %v1397_v42 = vpop.eup %1396 }
 0x20f   : > { %v628_v43 = vmul.f32 0.6931472, %v1397_v42 }
 0x211   : > { %v630_v44 = vsel %vm616_vm12, %v614_v30, %v628_v43 }
 0x212   : > { %651 = vst.msk [vmem:[#allocation2 + $0x8] sm:$0xff] %vm591_vm10, %v630_v44  ;;  %v653_v45 = vmul.f32 %v630_v44, %v1852_v22 }
 0x214   : > { %655 = vst.msk [vmem:[#allocation3 + $0x8] sm:$0xff] %vm591_vm10, %v653_v45 }
 0x24b   : > { %v643_v46 = vpop.permute.xlu2 %642 }
 0x24c   : > { %648 = vst.msk [vmem:[#allocation6] sm:$0xff] %vm639_vm13, %v643_v46 }
 0x253   : > { %v645_v47 = vpop.permute.xlu2 %644 }
 0x254   : > { %649 = vst.msk [vmem:[#allocation6 + $0x8] sm:$0xff] %vm639_vm13, %v645_v47 }
 0x263   : > { %v634_v48 = vpop.permute.xlu1 %633 }
 0x264   : > { %640 = vst.msk [vmem:[#allocation5] sm:$0xff] %vm639_vm13, %v634_v48 }
 0x26b   : > { %v636_v49 = vpop.permute.xlu1 %635 }
 0x26c   : > { %641 = vst.msk [vmem:[#allocation5 + $0x8] sm:$0xff] %vm639_vm13, %v636_v49 }
 0x26d LB: >> { %v722_v51 = vlaneseq  ;;  %s1882_s19 = sshll.u32 %s1636_s15, 3  ;;  %vm953_vm14 = vcmask 1041409   ;;  %vm955_vm15 = vcmask 1042434   ;;  %vm957_vm1 = vcmask 1043459   ;;  %s662_s15 = sadd.s32 1, %s1636_s15   ;;  %s1636_s15 = sphi %s1873_s15, %s662_s15   ;;  %v1632_v50 = vphi %v1871_v50, %v824_v50  }
 0x26e   : >> { %s669_s22 = scalar_lea.vmem [#allocation5], %s1882_s19  ;;  %s671_s24 = scalar_lea.vmem [#allocation6], %s1882_s19  ;;  %vm959_vm2 = vcmask 1044484   ;;  %vm961_vm3 = vcmask 1045509   ;;  %vm963_vm4 = vcmask 1046534   ;;  %vm965_vm5 = vcmask 1047559  }
 0x26f   : >> { %v723_v52 = vshrl.u32 %v722_v51, 7  ;;  %v672_v61 = vld [vmem:[%s671_s24] sm:$0xff]  ;;  %s665_s28 = scalar_lea.vmem [#allocation2], %s1882_s19  ;;  %s667_s30 = scalar_lea.vmem [#allocation3], %s1882_s19 }
 0x270   : >> { %v832_v62 = vperm.slane %v672_v61, 1  ;;  %v825_v63 = vperm.slane %v672_v61, 0  ;;  %v846_v4 = vperm.slane %v672_v61, 3  ;;  %v839_v6 = vperm.slane %v672_v61, 2  ;;  %v666_v11 = vld [vmem:[%s665_s28] sm:$0xff]  ;;  %s968_s18 = scalar_lea.vmem [#allocation4], %s1882_s19 }
 0x271   : >> { %1400 = vset.pattern.permute.xlu2 %v723_v52  ;;  %1399 = vset.pattern.permute.xlu1 %v723_v52  ;;  %v867_v7 = vperm.slane %v672_v61, 6  ;;  %v860_v8 = vperm.slane %v672_v61, 5  ;;  %v853_v9 = vperm.slane %v672_v61, 4  ;;  %v874_v10 = vperm.slane %v672_v61, 7  ;;  %v1892_v24 = vld [vmem:[%s667_s30] sm:$0xff]  ;;  %p659_p0 = scmp.ge.s32.totalorder %s662_s15, 2  }
 0x272   : >> { %1398 = vset.pattern.permute.xlu0 %v723_v52  ;;  %v681_v12 = vperm.slane %v666_v11, 0  ;;  %v674_v14 = vrot.slane %v666_v11, 1  ;;  %v675_v15 = vrot.slane %v666_v11, 2  ;;  %v676_v20 = vrot.slane %v666_v11, 3  ;;  %s1566_s12 = scalar_lea.hbm (%p659_p0), %s2002_s10, 32 }
 0x273   : >> { %v670_v53 = vld [vmem:[%s669_s22] sm:$0xff]  ;;  %v677_v28 = vrot.slane %v666_v11, 4  ;;  %v785_v29 = vperm.slane %v1892_v24, 0  ;;  %v678_v36 = vrot.slane %v666_v11, 5  ;;  %v778_v41 = vrot.slane %v1892_v24, 1 }
 0x274   : >> { %v749_v54 = vperm.slane %v670_v53, 4  ;;  %v735_v56 = vperm.slane %v670_v53, 2  ;;  %v721_v57 = vperm.slane %v670_v53, 0  ;;  %v756_v58 = vperm.slane %v670_v53, 5 }
 0x275   : >> { %v742_v59 = vperm.slane %v670_v53, 3  ;;  %v728_v60 = vperm.slane %v670_v53, 1  ;;  %v763_v3 = vperm.slane %v670_v53, 6  ;;  %v770_v5 = vperm.slane %v670_v53, 7 }
 0x276   : >> { %v697_v13 = vmul.f32 %v681_v12, %v1803_v0  ;;  %v682_v17 = vperm.slane %v674_v14, 0  ;;  %v683_v19 = vperm.slane %v675_v15, 0  ;;  %v684_v26 = vperm.slane %v676_v20, 0 }
 0x277   : >> { %v685_v37 = vperm.slane %v677_v28, 0  ;;  %v679_v43 = vrot.slane %v666_v11, 6  ;;  %v686_v44 = vperm.slane %v678_v36, 0  ;;  %v779_v46 = vrot.slane %v1892_v24, 2 }
 0x278   : >> { %v705_v16 = vmul.f32 1.442695, %v697_v13  ;;  %v698_v23 = vmul.f32 %v682_v17, %v1803_v0  ;;  %v699_v25 = vmul.f32 %v683_v19, %v1803_v0  ;;  %v700_v35 = vmul.f32 %v684_v26, %v1803_v0 }
 0x279   : >> { %754 = vperm.xlu2 %1400, %v749_v54   ;;  %740 = vperm.xlu1 %1399, %v735_v56   ;;  %v701_v45 = vmul.f32 %v685_v37, %v1803_v0  ;;  %v786_v48 = vperm.slane %v778_v41, 0  ;;  %v687_v53 = vperm.slane %v679_v43, 0  ;;  %v702_v54 = vmul.f32 %v686_v44, %v1803_v0 }
 0x27a   : >> { %726 = vperm.xlu0 %1398, %v721_v57   ;;  %1401 = vpow2.f32 %v705_v16  ;;  %v707_v27 = vmul.f32 1.442695, %v698_v23  ;;  %v709_v32 = vmul.f32 1.442695, %v699_v25  ;;  %v711_v42 = vmul.f32 1.442695, %v700_v35 }
 0x27b   : >> { %v787_v57 = vperm.slane %v779_v46, 0  ;;  %v782_v15 = vrot.slane %v1892_v24, 5  ;;  %v783_v36 = vrot.slane %v1892_v24, 6 }
 0x27c   : >> { %1403 = vpow2.f32 %v707_v27 }
 0x27d   : >> { %1405 = vpow2.f32 %v709_v32 }
 0x27e   : >> { %1407 = vpow2.f32 %v711_v42 }
 0x280   : >> { %v1402_v30 = vpop.eup %1401 }
 0x281   : >> { %761 = vperm.xlu2 %1400, %v756_v58   ;;  %747 = vperm.xlu1 %1399, %v742_v59   ;;  %v809_v40 = vmul.f32 %v1632_v50, %v1402_v30  ;;  %v713_v50 = vmul.f32 1.442695, %v701_v45  ;;  %v780_v58 = vrot.slane %v1892_v24, 3  ;;  %v790_v30 = vperm.slane %v782_v15, 0 }
 0x282   : >> { %733 = vperm.xlu0 %1398, %v728_v60   ;;  %v1404_v49 = vpop.eup %1403 }
 0x283   : >> { %v1406_v56 = vpop.eup %1405  ;;  %1409 = vpow2.f32 %v713_v50 }
 0x289   : >> { %837 = vperm.xlu2 %1400, %v832_v62   ;;  %830 = vperm.xlu1 %1399, %v825_v63   ;;  %v680_v62 = vrot.slane %v666_v11, 7 }
 0x28a   : >> { %768 = vperm.xlu0 %1398, %v763_v3   ;;  %v703_v3 = vmul.f32 %v687_v53, %v1803_v0 }
 0x28c   : >> { %v717_v11 = vmul.f32 1.442695, %v703_v3 }
 0x291   : >> { %851 = vperm.xlu2 %1400, %v846_v4   ;;  %775 = vperm.xlu1 %1399, %v770_v5   ;;  %v715_v4 = vmul.f32 1.442695, %v702_v54  ;;  %v781_v5 = vrot.slane %v1892_v24, 4 }
 0x292   : >> { %844 = vperm.xlu0 %1398, %v839_v6  }
 0x293   : >> { %1411 = vpow2.f32 %v715_v4  ;;  %v789_v19 = vperm.slane %v781_v5, 0 }
 0x294   : >> { %1413 = vpow2.f32 %v717_v11 }
 0x299   : >> { %872 = vperm.xlu2 %1400, %v867_v7   ;;  %865 = vperm.xlu1 %1399, %v860_v8   ;;  %v788_v7 = vperm.slane %v780_v58, 0 }
 0x29a   : >> { %858 = vperm.xlu0 %1398, %v853_v9   ;;  %v1408_v9 = vpop.eup %1407 }
 0x29b   : >> { %v1410_v25 = vpop.eup %1409 }
 0x2a2   : >> { %879 = vperm.xlu0 %1398, %v874_v10   ;;  %v688_v10 = vperm.slane %v680_v62, 0 }
 0x2a4   : >> { %v704_v27 = vmul.f32 %v688_v10, %v1803_v0 }
 0x2a6   : >> { %v719_v41 = vmul.f32 1.442695, %v704_v27 }
 0x2a8   : >> { %1415 = vpow2.f32 %v719_v41 }
 0x2d3   : >> { %v1888_v18 = vpop.permute.xlu2 %754 }
 0x2db   : >> { %v1896_v33 = vpop.permute.xlu2 %761 }
 0x2e3   : >> { %v838_v61 = vpop.permute.xlu2 %837 }
 0x2eb   : >> { %v741_v31 = vpop.permute.xlu1 %740 }
 0x2ec   : >> { %v727_v34 = vpop.permute.xlu0 %726  ;;  %v803_v6 = vmul.f32 %v787_v57, %v741_v31  ;;  %v852_v31 = vpop.permute.xlu2 %851 }
 0x2ed   : >> { %v801_v38 = vmul.f32 %v785_v29, %v727_v34  ;;  %v805_v34 = vmul.f32 %v789_v19, %v1888_v18 }
 0x2ef   : >> { %v810_v47 = vadd.f32 %v809_v40, %v801_v38  ;;  %v1412_v38 = vpop.eup %1411 }
 0x2f1   : >> { %v811_v60 = vmul.f32 %v1404_v49, %v810_v47 }
 0x2f3   : >> { %v748_v51 = vpop.permute.xlu1 %747 }
 0x2f4   : >> { %v734_v52 = vpop.permute.xlu0 %733  ;;  %v804_v20 = vmul.f32 %v788_v7, %v748_v51  ;;  %v873_v5 = vpop.permute.xlu2 %872 }
 0x2f5   : >> { %v802_v59 = vmul.f32 %v786_v48, %v734_v52  ;;  %v791_v48 = vperm.slane %v783_v36, 0  ;;  %v1414_v52 = vpop.eup %1413 }
 0x2f6   : >> { %v1416_v4 = vpop.eup %1415 }
 0x2f7   : >> { %v812_v63 = vadd.f32 %v811_v60, %v802_v59  ;;  %v784_v60 = vrot.slane %v1892_v24, 7 }
 0x2f9   : >> { %v813_v8 = vmul.f32 %v1406_v56, %v812_v63  ;;  %v882_v13 = vmul.f32 %v838_v61, %v812_v63 }
 0x2fb   : >> { %v814_v12 = vadd.f32 %v813_v8, %v803_v6  ;;  %v831_v14 = vpop.permute.xlu1 %830  ;;  %v896_v29 = vsel %vm591_vm10, %v882_v13, 0.0 }
 0x2fc   : >> { %v881_v16 = vmul.f32 %v831_v14, %v810_v47  ;;  %v769_v17 = vpop.permute.xlu0 %768  ;;  %v897_v40 = vrot.slane %v896_v29, 4  ;;  %v806_v47 = vmul.f32 %v790_v30, %v1896_v33 }
 0x2fd   : >> { %v815_v23 = vmul.f32 %v1408_v9, %v814_v12  ;;  %v807_v58 = vmul.f32 %v791_v48, %v769_v17 }
 0x2fe   : >> { %v889_v26 = vsel %vm591_vm10, %v881_v16, 0.0  ;;  %v898_v18 = vadd.f32 %v897_v40, %v896_v29 }
 0x2ff   : >> { %v816_v28 = vadd.f32 %v815_v23, %v804_v20  ;;  %v890_v32 = vrot.slane %v889_v26, 4 }
 0x300   : >> { %v899_v61 = vrot.slane %v898_v18, 2 }
 0x301   : >> { %v884_v35 = vmul.f32 %v852_v31, %v816_v28  ;;  %v817_v37 = vmul.f32 %v1410_v25, %v816_v28  ;;  %v891_v45 = vadd.f32 %v890_v32, %v889_v26 }
 0x302   : >> { %v900_v14 = vadd.f32 %v899_v61, %v898_v18 }
 0x303   : >> { %v910_v42 = vsel %vm591_vm10, %v884_v35, 0.0  ;;  %v818_v43 = vadd.f32 %v817_v37, %v805_v34  ;;  %v776_v44 = vpop.permute.xlu1 %775  ;;  %v892_v56 = vrot.slane %v891_v45, 2 }
 0x304   : >> { %v845_v46 = vpop.permute.xlu0 %844  ;;  %v911_v53 = vrot.slane %v910_v42, 4  ;;  %v901_v30 = vrot.slane %v900_v14, 1 }
 0x305   : >> { %v819_v49 = vmul.f32 %v1412_v38, %v818_v43  ;;  %v883_v51 = vmul.f32 %v845_v46, %v814_v12  ;;  %v893_v6 = vadd.f32 %v892_v56, %v891_v45  ;;  %v792_v12 = vperm.slane %v784_v60, 0 }
 0x306   : >> { %v912_v62 = vadd.f32 %v911_v53, %v910_v42  ;;  %v902_v45 = vadd.f32 %v901_v30, %v900_v14 }
 0x307   : >> { %v820_v54 = vadd.f32 %v819_v49, %v806_v47  ;;  %v903_v50 = vsel %vm591_vm10, %v883_v51, 0.0  ;;  %v894_v23 = vrot.slane %v893_v6, 1  ;;  %v808_v27 = vmul.f32 %v792_v12, %v776_v44 }
 0x308   : >> { %v904_v57 = vrot.slane %v903_v50, 4  ;;  %v913_v15 = vrot.slane %v912_v62, 2 }
 0x309   : >> { %v821_v59 = vmul.f32 %v1414_v52, %v820_v54  ;;  %v895_v36 = vadd.f32 %v894_v23, %v893_v6 }
 0x30a   : >> { %v905_v63 = vadd.f32 %v904_v57, %v903_v50  ;;  %v914_v31 = vadd.f32 %v913_v15, %v912_v62 }
 0x30b   : >> { %v822_v33 = vadd.f32 %v821_v59, %v807_v58  ;;  %v866_v3 = vpop.permute.xlu1 %865  ;;  %v954_v48 = vsel %vm953_vm14, %v902_v45, %v895_v36 }
 0x30c   : >> { %v906_v7 = vrot.slane %v905_v63, 2  ;;  %v886_v8 = vmul.f32 %v866_v3, %v820_v54  ;;  %v859_v9 = vpop.permute.xlu0 %858  ;;  %v915_v46 = vrot.slane %v914_v31, 1 }
 0x30d   : >> { %v887_v10 = vmul.f32 %v873_v5, %v822_v33  ;;  %v885_v13 = vmul.f32 %v859_v9, %v818_v43  ;;  %v823_v20 = vmul.f32 %v1416_v4, %v822_v33  ;;  %v981_v9 = vsub.f32 (%p659_p0), 0.0, %v1841_v55 }
 0x30e   : >> { %v907_v16 = vadd.f32 %v906_v7, %v905_v63  ;;  %v924_v17 = vsel %vm591_vm10, %v886_v8, 0.0  ;;  %v916_v54 = vadd.f32 %v915_v46, %v914_v31  ;;  %v980_v8 = vsub.f32 (%p659_p0), 0.0, %v1832_v39 }
 0x30f   : >> { %v931_v24 = vsel %vm591_vm10, %v887_v10, 0.0  ;;  %v925_v11 = vrot.slane %v924_v17, 4  ;;  %v917_v19 = vsel %vm591_vm10, %v885_v13, 0.0  ;;  %v824_v50 = vadd.f32 %v823_v20, %v808_v27   ;;  %v1267_v10 = vld [vmem:[%s2001_s9 + $0x18] sm:$0xff] (%p659_p0)  ;;  %v1265_v20 = vld [vmem:[%s2001_s9 + $0x8] sm:$0xff] (%p659_p0) }
 0x310   : >> { %v932_v25 = vrot.slane %v931_v24, 4  ;;  %v918_v26 = vrot.slane %v917_v19, 4  ;;  %v908_v28 = vrot.slane %v907_v16, 1  ;;  %v982_v12 = vmul.f32 (%p659_p0), 1.442695, %v980_v8  ;;  %1042 = vmatpush.bf16.msra.mxu2 (%p659_p0), %v1267_v10 }
 0x311   : >> { %v926_v29 = vadd.f32 %v925_v11, %v924_v17  ;;  %v984_v13 = vmul.f32 (%p659_p0), 1.442695, %v981_v9 }
 0x312   : >> { %v933_v32 = vadd.f32 %v932_v25, %v931_v24  ;;  %v919_v34 = vadd.f32 %v918_v26, %v917_v19  ;;  %v909_v41 = vadd.f32 %v908_v28, %v907_v16  ;;  %1418 = vpow2.f32 (%p659_p0), %v982_v12  ;;  %v1266_v19 = vld [vmem:[%s2001_s9 + $0x10] sm:$0xff] (%p659_p0) }
 0x313   : >> { %v927_v35 = vrot.slane %v926_v29, 2  ;;  %1420 = vpow2.f32 (%p659_p0), %v984_v13 }
 0x314   : >> { %v920_v37 = vrot.slane %v919_v34, 2  ;;  %v880_v38 = vpop.permute.xlu0 %879  ;;  %v934_v40 = vrot.slane %v933_v32, 2  ;;  %v956_v53 = vsel %vm955_vm15, %v909_v41, %v954_v48  ;;  %1043 = vmatpush.bf16.msra.mxu2 (%p659_p0), %v1266_v19 }
 0x315   : >> { %v928_v42 = vadd.f32 %v927_v35, %v926_v29  ;;  %v888_v43 = vmul.f32 %v880_v38, %v824_v50  ;;  %v958_v59 = vsel %vm957_vm1, %v916_v54, %v956_v53 }
 0x316   : >> { %v921_v44 = vadd.f32 %v920_v37, %v919_v34  ;;  %v935_v18 = vadd.f32 %v934_v40, %v933_v32 }
 0x317   : >> { %v938_v47 = vsel %vm591_vm10, %v888_v43, 0.0  ;;  %v929_v49 = vrot.slane %v928_v42, 1 }
 0x318   : >> { %v922_v51 = vrot.slane %v921_v44, 1  ;;  %v939_v52 = vrot.slane %v938_v47, 4  ;;  %v936_v61 = vrot.slane %v935_v18, 1  ;;  %v1419_v14 = vpop.eup (%p659_p0), %1418  ;;  %1044 = vmatpush.bf16.msra.mxu2 (%p659_p0), %v1265_v20 }
 0x319   : >> { %v930_v58 = vadd.f32 %v929_v49, %v928_v42  ;;  %v1421_v15 = vpop.eup (%p659_p0), %1420  ;;  %v986_v16 = vadd.f32 (%p659_p0), 1.0, %v1419_v14 }
 0x31a   : >> { %v923_v56 = vadd.f32 %v922_v51, %v921_v44  ;;  %v940_v57 = vadd.f32 %v939_v52, %v938_v47  ;;  %v937_v4 = vadd.f32 %v936_v61, %v935_v18  ;;  %v987_v50 = vadd.f32 (%p659_p0), 1.0, %v1421_v15 }
 0x31b   : > { %1422 = vrcp.f32 (%p659_p0), %v986_v16 }
 0x31c   : >> { %v941_v60 = vrot.slane %v940_v57, 2  ;;  %v960_v62 = vsel %vm959_vm2, %v923_v56, %v958_v59  ;;  %1424 = vrcp.f32 (%p659_p0), %v987_v50 }
 0x31d   : >> { %v962_v33 = vsel %vm961_vm3, %v930_v58, %v960_v62 }
 0x31e   : >> { %v942_v63 = vadd.f32 %v941_v60, %v940_v57  ;;  %v964_v6 = vsel %vm963_vm4, %v937_v4, %v962_v33 }
 0x320   : >> { %v943_v3 = vrot.slane %v942_v63, 1 }
 0x321   : > { %661 = sbr.rel (!%p659_p0) target bundleno = 621 (0x26d), region = 124  ;;  %v1423_v17 = vpop.eup (%p659_p0), %1422 }
 0x322   : >> { %v944_v5 = vadd.f32 %v943_v3, %v942_v63  ;;  %v990_v0 = vmul.f32 (%p659_p0), %v1423_v17, %v1832_v39  ;;  %v1425_v24 = vpop.eup (%p659_p0), %1424  ;;  %v1264_v39 = vld [vmem:[%s2001_s9] sm:$0xff] (%p659_p0) }
 0x323   : > { %v991_v11 = vmul.f32 (%p659_p0), %v1425_v24, %v1841_v55  ;;  %1045 = vmatpush.bf16.msra.mxu2 (%p659_p0), %v1264_v39  ;;  %v1417_v55 = vld [vmem:[%s2000_s8] ss:$0 sm:$0xff] (%p659_p0) }
 0x324   : >> { %v966_v7 = vsel %vm965_vm5, %v944_v5, %v964_v6  ;;  %994 = vrot.lane.b32.xlu0 (%p659_p0), %v990_v0, %s1645_s21  ;;  %v976_v25 = vmul.f32 (%p659_p0), %v1417_v55, %v1850_v21  ;;  %v977_v26 = vmul.f32 (%p659_p0), %v1417_v55, %v1852_v22 }
 0x325   : >> { %969 = vst.msk [vmem:[%s968_s18] sm:$0xff] %vm591_vm10, %v966_v7  ;;  %s1069_s18 = sshll.u32 (%p659_p0), %s1869_s1, 4  ;;  %s1070_s18 = int_to_ptr.vmem [resolvable:$true] %s1069_s18 }
 0x32c   : > { %996 = vrot.lane.b32.xlu0 %v991_v11, %s1645_s21  ;;  %v970_v27 = vld [vmem:[#allocation4] sm:$0xff]  ;;  %v971_v28 = vld [vmem:[#allocation4 + $0x8] sm:$0xff]  ;;  %s1268_s21 = sshll.u32 %s1724_s17, 4  ;;  %s1057_s17 = scalar_lea.sflag [#allocation9], %s411_s25 }
 0x32d   : > { %v978_v29 = vadd.f32 %v976_v25, %v970_v27  ;;  %v979_v30 = vadd.f32 %v977_v26, %v971_v28  ;;  %s1068_s30 = scalar_lea.hbm %s2002_s10, %s1268_s21 }
 0x32e   : > { %s1071_s20 = sshll.u32 %s1068_s30, 4  ;;  %s1072_s20 = int_to_ptr.hbm [resolvable:$true] %s1071_s20 }
 0x32f   : > { %s1560_s26 = sshra.s32 %s1072_s20, 4  ;;  %s1561_s26 = int_to_ptr.hbm [resolvable:$true] %s1560_s26 }
 0x330   : > { %s1562_s27 = scalar_lea.hbm %s1561_s26, 16  ;;  %p1567_p4 = scmp.lt.s32.totalorder %s1561_s26, %s2002_s10 }
 0x331   : > { %p1563_p1 = scmp.ne.s32.totalorder %s1561_s26, %s1562_s27  ;;  %p1568_p7 = scmp.lt.s32.totalorder %s1566_s12, %s1562_s27 }
 0x333   : > { %p1564_p2 = pnand %p1563_p1, %p1741_p5  ;;  %p1569_p8 = por %p1568_p7, %p1567_p4 }
 0x335   : > { %p1565_p3 = pneg %p1564_p2 }
 0x337   : > { %p1570_p9 = pnand %p1569_p8, %p1565_p3 }
 0x396   : > { %v995_v23 = vpop.permute.xlu0 %994 }
 0x397   : > { %v1000_v32 = vmul.f32 %v995_v23, %v978_v29 }
 0x39e   : > { %v997_v31 = vpop.permute.xlu0 %996 }
 0x39f   : > { %v1001_v34 = vmul.f32 %v997_v31, %v979_v30 }
 0x3a1   : > { %v1002_v35 = vpack.c.bf16 %v1001_v34, %v1000_v32 }
 0x3a3   : > { %1251 = vmatmul.msk.bf16.vlgmr.msra.gmra.mxu2 %vm591_vm10, %v1002_v35 }
 0x426   : > { %v1047_v36 = vpop.f32.mrf.mxu2 }
 0x427   : > { %v1052_v21 = vadd.f32 %v1047_v36, %v1805_v1 }
 0x429   : > { %1054 = vst.msk [vmem:[%s1869_s1] sm:$0xff] %vm424_vm0, %v1052_v21 }
 0x42e   : > { %v1049_v22 = vpop.f32.mrf.mxu2 }
 0x42f   : > { %v1053_v37 = vadd.f32 %v1049_v22, %v1807_v2 }
 0x431   : > { %1055 = vst.msk [vmem:[%s1869_s1 + $0x8] sm:$0xff] %vm424_vm0, %v1053_v37 }
 0x432   : > { %1573 = shalt.err (!%p1570_p9)
}
 0x433   : > { %s1646_s25 = smov 128   ;;  %s1647_s1 = smov 8  }
 0x434   : > { %1285 = dma.vmem_to_hbm [thread:$0]  (%p1741_p5), %s1070_s18, 256, %s1072_s20, %s1057_s17, %s1646_s25, %s1646_s25, %s1647_s1  }
 0x435 PF: > { %p1312_p10 = scmp.ge.s32.totalorder %s1628_s16, 2  ;;  %s1086_s22 = sand.u32 1, %s1616_s13  }
 0x436   : > { %s1087_s21 = scalar_lea.sflag [#allocation9], %s1086_s22 }
 0x437   : > { %p1301_p11 = pnand %p1312_p10, %p1745_p6 }
 0x439   : > { %p1302_p12 = pneg %p1301_p11 }
 0x43b   : > { %1611 = dma.done.wait (%p1302_p12), %s1087_s21, 256  }
 0x43c   : > { %1613 = vsyncadd (%p1302_p12), %s1087_s21, 4294967040  ;;  %s2020_s16 = sld [smem:[#allocation21_spill]]  ;;  %s2023_s13 = smov %s1620_s14 }
 0x43d   : > { %s2021_s24 = sld [smem:[#allocation20_spill]] }
 0x43e   : > { %s2022_s15 = sld [smem:[#allocation22_spill]] }
 0x442   : > { %p23_p13 = scmp.ge.s32.totalorder %s2020_s16, 4  }
 0x443   : > { %s2024_s14 = smov %s2021_s24 }
 0x444   :  { %25 = sbr.rel (!%p23_p13) target bundleno = 9 (0x9), region = 135 }
 0x449   :  { %1093 = vsyncpa [#allocation8], 1 }
 0x44a   :  { %1095 = vsyncpa [#allocation8 + $0x1], 1 }
 0x44b   :  { %1096 = vsyncpa [#allocation11], 1 }
 0x44c   :  { %1097 = vsyncpa [#allocation14], 1 }
 0x44d   :  { %1098 = vsyncpa [#allocation9], 1 }
 0x44e   :  { %1100 = vsyncpa [#allocation9 + $0x1], 1 }

</bundles_post_ra>
